<compile_context>
chip_gen: v7x
topology: tpu7x:2x2x1
jax: 0.10.0
libtpu: 0.0.40
codegen_flags: <defaults>
</compile_context>

<pallas_src>
import numpy as np
import jax
import jax.numpy as jnp
from jax.experimental import pallas as pl
from jax.experimental.pallas import tpu as pltpu

# ---------------- Wav2Mel defaults (from the PyTorch __init__) ----------------
SAMPLE_RATE = 16000
NORM_DB = -3.0
FFT_WINDOW_MS = 25.0
FFT_HOP_MS = 10.0
F_MIN = 50.0
N_MELS = 40

N_FFT = int(SAMPLE_RATE * FFT_WINDOW_MS / 1000)   # 400
HOP = int(SAMPLE_RATE * FFT_HOP_MS / 1000)        # 160
N_FREQ = N_FFT // 2 + 1                           # 201 (onesided)


def _round_up(x, m):
    return (x + m - 1) // m * m


# Padded dims so lane/sublane tiles are dense on TPU.
K_PAD = _round_up(N_FFT, 128)    # 512
F_PAD = _round_up(N_FREQ, 128)   # 256
M_PAD = _round_up(N_MELS, 128)   # 128
TM_MAX = 256                     # large frame tile: good MXU utilization
TM_MIN = 16                      # bf16 sublane tile


# -------------------- deterministic "weights" (bases / fbank) -----------------
def _hann_window(n):
    # torch.hann_window(n, periodic=True)
    i = np.arange(n, dtype=np.float64)
    return (0.5 - 0.5 * np.cos(2.0 * np.pi * i / n)).astype(np.float32)


def _hz_to_mel_htk(f):
    return 2595.0 * np.log10(1.0 + f / 700.0)


def _mel_to_hz_htk(m):
    return 700.0 * (10.0 ** (m / 2595.0) - 1.0)


def _melscale_fbanks(n_freqs, f_min, f_max, n_mels, sample_rate):
    # torchaudio.functional.melscale_fbanks, mel_scale="htk", norm=None
    all_freqs = np.linspace(0, sample_rate // 2, n_freqs)
    m_pts = np.linspace(_hz_to_mel_htk(f_min), _hz_to_mel_htk(f_max), n_mels + 2)
    f_pts = _mel_to_hz_htk(m_pts)
    f_diff = f_pts[1:] - f_pts[:-1]
    slopes = f_pts[None, :] - all_freqs[:, None]          # (n_freqs, n_mels+2)
    down = (-slopes[:, :-2]) / f_diff[:-1]
    up = slopes[:, 2:] / f_diff[1:]
    fb = np.maximum(0.0, np.minimum(down, up))
    return fb.astype(np.float32)                           # (n_freqs, n_mels)


def _build_constants():
    """Fused windowed-DFT basis [cos | sin] and mel filterbank, bf16, padded."""
    win = _hann_window(N_FFT)                                       # (400,)
    n = np.arange(N_FFT, dtype=np.float64)[:, None]                 # (400, 1)
    k = np.arange(N_FREQ, dtype=np.float64)[None, :]                # (1, 201)
    ang = 2.0 * np.pi * n * k / N_FFT
    cos_b = (win[:, None] * np.cos(ang)).astype(np.float32)         # (400, 201)
    sin_b = (win[:, None] * np.sin(ang)).astype(np.float32)         # (400, 201)
    fb = _melscale_fbanks(N_FREQ, F_MIN, SAMPLE_RATE / 2.0, N_MELS, SAMPLE_RATE)

    basis = np.zeros((K_PAD, 2 * F_PAD), np.float32)
    basis[:N_FFT, :N_FREQ] = cos_b                                  # real part
    basis[:N_FFT, F_PAD:F_PAD + N_FREQ] = sin_b                     # imag part
    fb_p = np.zeros((F_PAD, M_PAD), np.float32)
    fb_p[:N_FREQ, :N_MELS] = fb
    return (jnp.asarray(basis, jnp.bfloat16),
            jnp.asarray(fb_p, jnp.bfloat16))


BASIS, FB = _build_constants()


# ------------------------------- Pallas kernel --------------------------------
def _logmel_kernel(gain2_ref, frames_ref, basis_ref, fb_ref, out_ref):
    # frames: (TM, K_PAD) bf16 ; basis: (K_PAD, 2*F_PAD) bf16 = [cos | sin]
    ri = jnp.dot(frames_ref[...], basis_ref[...],
                 preferred_element_type=jnp.float32)                # (TM, 2*F_PAD)
    re = ri[:, :F_PAD]
    im = ri[:, F_PAD:]
    # |STFT|^2 of the peak-normalized waveform: apply gain^2 on the power (f32),
    # BEFORE the mel matmul / clamp, so clamp semantics match the reference.
    power = (re * re + im * im) * gain2_ref[0]
    mel = jnp.dot(power.astype(jnp.bfloat16), fb_ref[...],
                  preferred_element_type=jnp.float32)               # (TM, M_PAD)
    out_ref[...] = jnp.log(jnp.maximum(mel, 1e-9))                  # clamp + log


def _logmel_pallas(frames_pad, gain2, tm):
    t_pad = frames_pad.shape[0]
    grid = (t_pad // tm,)
    return pl.pallas_call(
        _logmel_kernel,
        out_shape=jax.ShapeDtypeStruct((t_pad, M_PAD), jnp.float32),
        grid_spec=pltpu.PrefetchScalarGridSpec(
            num_scalar_prefetch=0,
            grid=grid,
            in_specs=[
                pl.BlockSpec(memory_space=pltpu.MemorySpace.SMEM),      # gain^2
                pl.BlockSpec((tm, K_PAD), lambda i: (i, 0)),            # frames
                pl.BlockSpec((K_PAD, 2 * F_PAD), lambda i: (0, 0)),     # [cos|sin]
                pl.BlockSpec((F_PAD, M_PAD), lambda i: (0, 0)),         # mel fbank
            ],
            out_specs=pl.BlockSpec((tm, M_PAD), lambda i: (i, 0)),
        ),
        compiler_params=pltpu.CompilerParams(
            dimension_semantics=("parallel",)),
    )(gain2, frames_pad, BASIS, FB)


def _pick_tm(n_frames):
    """Largest power-of-two tile <= TM_MAX that still yields >=2 grid steps
    (keeps both v7x TensorCores busy on short clips)."""
    tm = TM_MAX
    while tm > TM_MIN and _round_up(n_frames, tm) // tm < 2:
        tm //= 2
    return tm


# ---------------------------------- glue --------------------------------------
def wav2mel(wav, sample_rate):
    """wav: (channels, samples) float32. Returns (n_frames, n_mels) log-mel."""
    wav = jnp.asarray(wav, jnp.float32)

    # --- SoxEffects ---
    # ["channels", "1"]: mix-down to mono by averaging channels.
    mono = jnp.mean(wav, axis=0)
    # ["rate", "16000"]: identity when input rate already matches target.
    # TODO(synk): arbitrary-rate sinc resampling not implemented (assumes
    # sample_rate == SAMPLE_RATE, as in this example).
    assert sample_rate == SAMPLE_RATE
    # ["norm", "-3"]: linear gain so the peak sits at NORM_DB dBFS.  The gain is
    # NOT applied to the waveform here; it is folded into the kernel as gain^2
    # on the power spectrum (power is quadratic in the waveform), which avoids a
    # full HBM read-modify-write pass over the audio.
    peak = jnp.max(jnp.abs(mono))
    gain = (10.0 ** (NORM_DB / 20.0)) / jnp.maximum(peak, 1e-12)
    gain2 = (gain * gain).reshape(1).astype(jnp.float32)

    # --- STFT framing (torchaudio Spectrogram: center=True, reflect pad) ---
    pad = N_FFT // 2
    padded = jnp.pad(mono, (pad, pad), mode="reflect")
    n_samples = mono.shape[0]
    n_frames = n_samples // HOP + 1
    idx = (jnp.arange(n_frames)[:, None] * HOP + jnp.arange(N_FFT)[None, :])
    frames = padded[idx].astype(jnp.bfloat16)                        # (T, n_fft)

    # zero-pad to TPU-friendly tile sizes
    tm = _pick_tm(n_frames)
    t_pad = _round_up(n_frames, tm)
    frames_p = jnp.pad(frames, ((0, t_pad - n_frames), (0, K_PAD - N_FFT)))

    out = _logmel_pallas(frames_p, gain2, tm)                        # (t_pad, M_PAD)
    return out[:n_frames, :N_MELS]                                   # (time, n_mels)


# ---------------------------------- main ---------------------------------------
if __name__ == "__main__":
    key = jax.random.PRNGKey(0)
    # small example: 2-channel, 0.2 s of 16 kHz audio -> 21 frames x 40 mels
    wav = 0.1 * jax.random.normal(key, (2, 3200), dtype=jnp.float32)

    mel = wav2mel(wav, SAMPLE_RATE)
    jax.block_until_ready(mel)

    assert mel.shape == (3200 // HOP + 1, N_MELS), mel.shape
    assert bool(jnp.all(jnp.isfinite(mel)))
    print("KERNEL_OK")
</pallas_src>

<mosaic_0001>
module attributes {stable_mosaic.version = 11 : i64} {
  func.func @_logmel_kernel(%arg0: i32, %arg1: memref<1xf32, #tpu.memory_space<smem>>, %arg2: memref<16x512xbf16, #tpu.memory_space<vmem>>, %arg3: memref<512x512xbf16, #tpu.memory_space<vmem>>, %arg4: memref<256x128xbf16, #tpu.memory_space<vmem>>, %arg5: memref<16x128xf32, #tpu.memory_space<vmem>>) attributes {dimension_semantics = [#tpu.dimension_semantics<parallel>], iteration_bounds = array<i64: 2>, scalar_prefetch = 0 : i64, scratch_operands = 0 : i64, tpu.core_type = #tpu.core_type<tc>, window_params = [{transform_indices = @transform_0, window_bounds = array<i64: 1>}, {transform_indices = @transform_1, window_bounds = array<i64: 16, 512>}, {pipeline_mode = #tpu.pipeline_mode<synchronous>, transform_indices = @transform_2, window_bounds = array<i64: 512, 512>}, {pipeline_mode = #tpu.pipeline_mode<synchronous>, transform_indices = @transform_3, window_bounds = array<i64: 256, 128>}, {transform_indices = @transform_4, window_bounds = array<i64: 16, 128>}]} {
    %c0 = arith.constant 0 : index
    %c0_0 = arith.constant 0 : index
    %0 = vector.load %arg2[%c0, %c0_0] : memref<16x512xbf16, #tpu.memory_space<vmem>>, vector<16x512xbf16>
    %c0_1 = arith.constant 0 : index
    %c0_2 = arith.constant 0 : index
    %1 = vector.load %arg3[%c0_1, %c0_2] : memref<512x512xbf16, #tpu.memory_space<vmem>>, vector<512x512xbf16>
    %cst = arith.constant dense<0.000000e+00> : vector<16x512xf32>
    %2 = tpu.matmul %0, %1, %cst {dimension_numbers = #tpu.dot_dimension_numbers<[1], [0], [0], [1], [0, 0, 1, 1], [], []>} : vector<16x512xbf16>, vector<512x512xbf16>, vector<16x512xf32> -> vector<16x512xf32>
    %3 = vector.extract_strided_slice %2 {offsets = [0, 0], sizes = [16, 256], strides = [1, 1]} : vector<16x512xf32> to vector<16x256xf32>
    %4 = vector.extract_strided_slice %2 {offsets = [0, 256], sizes = [16, 256], strides = [1, 1]} : vector<16x512xf32> to vector<16x256xf32>
    %5 = arith.mulf %3, %3 : vector<16x256xf32>
    %6 = arith.mulf %4, %4 : vector<16x256xf32>
    %7 = arith.addf %5, %6 : vector<16x256xf32>
    %c0_3 = arith.constant 0 : index
    %8 = memref.load %arg1[%c0_3] : memref<1xf32, #tpu.memory_space<smem>>
    %9 = vector.broadcast %8 : f32 to vector<16x256xf32>
    %10 = arith.mulf %7, %9 : vector<16x256xf32>
    %11 = arith.truncf %10 : vector<16x256xf32> to vector<16x256xbf16>
    %c0_4 = arith.constant 0 : index
    %c0_5 = arith.constant 0 : index
    %12 = vector.load %arg4[%c0_4, %c0_5] : memref<256x128xbf16, #tpu.memory_space<vmem>>, vector<256x128xbf16>
    %cst_6 = arith.constant dense<0.000000e+00> : vector<16x128xf32>
    %13 = tpu.matmul %11, %12, %cst_6 {dimension_numbers = #tpu.dot_dimension_numbers<[1], [0], [0], [1], [0, 0, 1, 1], [], []>} : vector<16x256xbf16>, vector<256x128xbf16>, vector<16x128xf32> -> vector<16x128xf32>
    %cst_7 = arith.constant 9.99999971E-10 : f32
    %14 = vector.broadcast %cst_7 : f32 to vector<16x128xf32>
    %15 = arith.maximumf %13, %14 : vector<16x128xf32>
    %16 = math.log %15 : vector<16x128xf32>
    %c0_8 = arith.constant 0 : index
    %c0_9 = arith.constant 0 : index
    %17 = vector.load %arg5[%c0_8, %c0_9] : memref<16x128xf32, #tpu.memory_space<vmem>>, vector<16x128xf32>
    tpu.vector_store %arg5[%c0_8, %c0_9], %16 {strides = array<i32>} : memref<16x128xf32, #tpu.memory_space<vmem>>, vector<16x128xf32>,
    return
  }
  func.func @transform_0(%arg0: i32) -> i32 {
    %c0_i32 = arith.constant 0 : i32
    %c0_i32_0 = arith.constant 0 : i32
    return %c0_i32 : i32
  }
  func.func @transform_1(%arg0: i32) -> (i32, i32) {
    %c0_i32 = arith.constant 0 : i32
    %c0_i32_0 = arith.constant 0 : i32
    return %arg0, %c0_i32 : i32, i32
  }
  func.func @transform_2(%arg0: i32) -> (i32, i32) {
    %c0_i32 = arith.constant 0 : i32
    %c0_i32_0 = arith.constant 0 : i32
    %c0_i32_1 = arith.constant 0 : i32
    return %c0_i32, %c0_i32_0 : i32, i32
  }
  func.func @transform_3(%arg0: i32) -> (i32, i32) {
    %c0_i32 = arith.constant 0 : i32
    %c0_i32_0 = arith.constant 0 : i32
    %c0_i32_1 = arith.constant 0 : i32
    return %c0_i32, %c0_i32_0 : i32, i32
  }
  func.func @transform_4(%arg0: i32) -> (i32, i32) {
    %c0_i32 = arith.constant 0 : i32
    %c0_i32_0 = arith.constant 0 : i32
    return %arg0, %c0_i32 : i32, i32
  }
}

</mosaic_0001>

<bundles_post_ra>
// kernel: tpu_custom_call.1
= control target key start
LH: loop header
LB: loop body
LE: loop exit
PB: predicated region body
PF: predicated region fallthrough
CT: control target
= control target key end

     0   :  { %s2451_s0 = inlined_call_operand.<no memory space> [shape: f32[1], index: 0, kind: input, shape index: {}]   ;;  %s2452_s1 = inlined_call_operand.hbm [shape: bf16[32,512], index: 1, kind: input, shape index: {}]   ;;  %s2453_s2 = inlined_call_operand.hbm [shape: bf16[512,512], index: 2, kind: input, shape index: {}]   ;;  %s2454_s3 = inlined_call_operand.hbm [shape: bf16[256,128], index: 3, kind: input, shape index: {}]   ;;  %s2455_s4 = inlined_call_operand.hbm [shape: f32[32,128], index: 4, kind: output, shape index: {}]  }
   0x1   :  { %9 = sst [smem:[#allocation2]] %s2451_s0 }
   0x2   :  { %10 = vsyncpa [#allocation4], 0 }
   0x3   :  { %12 = vsyncpa [#allocation4 + $0x1], 0 }
   0x4   :  { %13 = vsyncpa [#allocation7], 0 }
   0x5   :  { %14 = vsyncpa [#allocation5], 0 }
   0x6   :  { %16 = vsyncpa [#allocation5 + $0x1], 0  ;;  %s2204_s17 = smov 0   ;;  %s2206_s18 = smov 0  }
   0x7   :  { %s2208_s19 = smov 0   ;;  %s2210_s20 = smov 0  }
   0x8 LB: > { %s2225_s0 = sadd.s32 4294967295, %s2164_s20   ;;  %s1517_s21 = sadd.s32 4294967294, %s2164_s20   ;;  %s2164_s20 = sphi %s2210_s20, %s2475_s20   ;;  %s2160_s19 = sphi %s2208_s19, %s2474_s19   ;;  %s2156_s18 = sphi %s2206_s18, %s2473_s18   ;;  %s2152_s17 = sphi %s2204_s17, %s2472_s17  }
   0x9   : > { %p63_p0 = scmp.ne.s32.totalorder %s2156_s18, %s2152_s17  ;;  %p2456_p1 = scmp.eq.s32.totalorder %s2225_s0, 0 }
   0xa   : > { %p135_p3 = scmp.eq.s32.totalorder %s1517_s21, 1  ;;  %p1518_p5 = scmp.ge.s32.totalorder %s2164_s20, 1 }
   0xb   : > { %p2234_p4 = por %p2456_p1, %p63_p0  ;;  %p142_p7 = scmp.lt.s32.totalorder %s2164_s20, 3 }
   0xc   : > { %p2239_p6 = por %p135_p3, %p63_p0  ;;  %s2166_s25 = smov [#allocation6]  }
   0xd   : > { %s2459_s22 = scalar_select %p2234_p4, 1, 0 }
   0xe   : > { %s2460_s23 = scalar_select %p2239_p6, 1, 0 }
   0xf   : > { %p2244_p8 = pnand %p1518_p5, %p142_p7  ;;  %s157_s26 = sshll.u32 %s2166_s25, 4  ;;  %s2248_s26 = int_to_ptr.vmem [resolvable:$true] %s157_s26 }
  0x10   : > { %s2167_s28 = smov [#allocation8]   ;;  %s2008_s6 = scalar_lea.hbm %s2453_s2, 16384 }
  0x11   : > { %p1729_p9 = pneg %p2244_p8  ;;  %s170_s29 = sshll.u32 %s2167_s28, 4  ;;  %s2259_s29 = int_to_ptr.vmem [resolvable:$true] %s170_s29 }
  0x12   : > { %p2009_p12 = scmp.ne.s32.totalorder %s2453_s2, %s2008_s6  ;;  %p2015_p5 = scmp.lt.u32.totalorder %s2008_s6, %s2453_s2 }
  0x13   : > { %p2255_p11 = pnand %p1729_p9, %p2456_p1 }
  0x15   : > { %p2010_p13 = pneg %p2255_p11 }
  0x17   : > { %p2011_p0 = pnand %p2010_p13, %p2009_p12 }
  0x19   : > { %p2012_p3 = pneg %p2011_p0 }
  0x1b   : > { %p2017_p7 = pnand %p2015_p5, %p2012_p3 }
  0x1d   : > { %2020 = shalt.err (!%p2017_p7)
}
  0x1e   : > { %s2021_s11 = scalar_lea.vmem %s2248_s26, 16384  ;;  %p2029_p2 = scmp.lt.s32.totalorder %s2248_s26, %s2248_s26 }
  0x1f   : > { %p2022_p9 = scmp.ne.s32.totalorder %s2248_s26, %s2021_s11  ;;  %p2030_p12 = scmp.lt.s32.totalorder %s2021_s11, %s2021_s11 }
  0x21   : > { %p2024_p10 = pnand %p2022_p9, %p2010_p13  ;;  %p2031_p0 = por %p2030_p12, %p2029_p2 }
  0x23   : > { %p2025_p1 = pneg %p2024_p10 }
  0x25   : > { %p2032_p6 = pnand %p2031_p0, %p2025_p1 }
  0x27   : > { %2035 = shalt.err (!%p2032_p6)
}
  0x28   : > { %s2168_s12 = smov 256   ;;  %s2169_s13 = smov 16  }
  0x29   : > { %1732 = dma.hbm_to_vmem [thread:$0]  (!%p2255_p11), %s2453_s2, 16384, %s2248_s26, [#allocation7], %s2168_s12, %s2168_s12, %s2169_s13  }
  0x2a   : > { %s2036_s25 = scalar_lea.hbm %s2454_s3, 2048 }
  0x2b   : > { %p2037_p1 = scmp.ne.s32.totalorder %s2454_s3, %s2036_s25  ;;  %p2043_p10 = scmp.lt.u32.totalorder %s2036_s25, %s2454_s3 }
  0x2d   : > { %p2039_p2 = pnand %p2037_p1, %p2010_p13 }
  0x2f   : > { %p2040_p6 = pneg %p2039_p2 }
  0x31   : > { %p2045_p3 = pnand %p2043_p10, %p2040_p6 }
  0x33   : > { %2048 = shalt.err (!%p2045_p3)
}
  0x34   : > { %s2049_s26 = scalar_lea.vmem %s2259_s29, 2048  ;;  %p2057_p12 = scmp.lt.s32.totalorder %s2259_s29, %s2259_s29 }
  0x35   : > { %p2050_p5 = scmp.ne.s32.totalorder %s2259_s29, %s2049_s26  ;;  %p2058_p0 = scmp.lt.s32.totalorder %s2049_s26, %s2049_s26 }
  0x37   : > { %p2052_p7 = pnand %p2050_p5, %p2010_p13  ;;  %p2059_p1 = por %p2058_p0, %p2057_p12 }
  0x39   : > { %p2053_p9 = pneg %p2052_p7 }
  0x3b   : > { %p2060_p2 = pnand %p2059_p1, %p2053_p9 }
  0x3d   : > { %2063 = shalt.err (!%p2060_p2)
}
  0x3e   : > { %s2170_s7 = smov 64   ;;  %s2171_s8 = smov 4  }
  0x3f   : > { %1735 = dma.hbm_to_vmem [thread:$0]  (!%p2255_p11), %s2454_s3, 2048, %s2259_s29, [#allocation7], %s2170_s7, %s2170_s7, %s2171_s8  }
  0x40   : > { %s2317_s11 = sadd.s32 1, %s2164_s20   ;;  %s50_s15 = sadd.s32 1, %s2160_s19 }
  0x41   : > { %s47_s14 = ssub.s32 %s2164_s20, %s2317_s11  ;;  %p57_p6 = scmp.ne.s32.totalorder %s2160_s19, %s2156_s18 }
  0x42   : > { %p48_p13 = scmp.eq.s32.totalorder %s47_s14, 0  ;;  %p58_p10 = scmp.eq.s32.totalorder %s2164_s20, 0 }
  0x43   : > { %p2463_p5 = scmp.eq.s32.totalorder %s2225_s0, 1  ;;  %p1746_p9 = scmp.lt.s32.totalorder %s2164_s20, 2 }
  0x44   : > { %s2326_s16 = scalar_select %p48_p13, %s2160_s19, %s50_s15  }
  0x45   : > { %p59_p3 = por %p58_p10, %p57_p6  ;;  %p2330_p7 = por %p2463_p5, %p57_p6 }
  0x46   : > { %s184_s27 = sand.u32 1, %s2160_s19   ;;  %s1685_s29 = sshll.u32 %s2164_s20, 9 }
  0x47   : > { %s2464_s21 = scalar_select %p2330_p7, 1, 0 }
  0x48   : > { %s1522_s25 = sshll.u32 %s184_s27, 5  ;;  %s2340_s5 = scalar_lea.hbm %s2452_s1, %s1685_s29 }
  0x49   : > { %s188_s6 = scalar_lea.vmem [#allocation3], %s1522_s25  ;;  %p2344_p11 = pnand %p1746_p9, %p59_p3 }
  0x4a   : > { %s196_s26 = sshll.u32 %s188_s6, 4  ;;  %s2348_s8 = scalar_lea.sflag [#allocation4], %s184_s27  ;;  %s2342_s26 = int_to_ptr.vmem [resolvable:$true] %s196_s26 }
  0x4b   : > { %s2064_s9 = scalar_lea.hbm %s2340_s5, 512  ;;  %p2066_p0 = pneg %p2344_p11 }
  0x4c   : > { %p2065_p12 = scmp.ne.s32.totalorder %s2340_s5, %s2064_s9  ;;  %s2069_s15 = scalar_lea.hbm %s2452_s1, 1024 }
  0x4d   : > { %p2070_p13 = scmp.lt.u32.totalorder %s2340_s5, %s2452_s1  ;;  %p2071_p6 = scmp.lt.u32.totalorder %s2069_s15, %s2064_s9 }
  0x4e   : > { %p2067_p1 = pnand %p2066_p0, %p2065_p12  ;;  %p2073_p3 = scmp.lt.u32.totalorder %s2064_s9, %s2340_s5 }
  0x4f   : > { %p2072_p10 = por %p2071_p6, %p2070_p13 }
  0x50   : > { %p2068_p2 = pneg %p2067_p1 }
  0x51   : > { %p2074_p5 = por %p2073_p3, %p2072_p10 }
  0x53   : > { %p2075_p9 = pnand %p2074_p5, %p2068_p2 }
  0x55   : > { %2078 = shalt.err (!%p2075_p9)
}
  0x56   : > { %s2079_s27 = scalar_lea.vmem %s2342_s26, 512  ;;  %s2172_s28 = smov [#allocation3]  }
  0x57   : > { %p2080_p12 = scmp.ne.s32.totalorder %s2342_s26, %s2079_s27  ;;  %s2084_s30 = sshll.u32 %s2172_s28, 4  ;;  %s2085_s30 = int_to_ptr.vmem [resolvable:$false] %s2084_s30 }
  0x58   : > { %s2086_s6 = scalar_lea.vmem %s2085_s30, 1024  ;;  %p2087_p4 = scmp.lt.s32.totalorder %s2342_s26, %s2085_s30 }
  0x59   : > { %p2082_p1 = pnand %p2080_p12, %p2066_p0  ;;  %p2088_p13 = scmp.lt.s32.totalorder %s2086_s6, %s2079_s27 }
  0x5b   : > { %p2083_p7 = pneg %p2082_p1  ;;  %p2089_p6 = por %p2088_p13, %p2087_p4 }
  0x5d   : > { %p2090_p10 = pnand %p2089_p6, %p2083_p7 }
  0x5f   : > { %2093 = shalt.err (!%p2090_p10)
}
  0x60   : > { %1739 = dma.hbm_to_vmem [thread:$0]  (!%p2344_p11), %s2340_s5, 512, %s2342_s26, %s2348_s8, %s2168_s12, %s2168_s12, %s2169_s13  }
  0x61   : > { %208 = sbr.rel (%p2244_p8) target bundleno = 708 (0x2c4), region = 36  ;;  %s2382_s9 = sand.u32 (!%p2244_p8), 1, %s2156_s18  }
  0x62   : > { %s1527_s10 = sshll.u32 (!%p2244_p8), %s2382_s9, 5  ;;  %s211_s14 = scalar_lea.sflag (!%p2244_p8), [#allocation4], %s2382_s9 }
  0x63   : > { %s2386_s15 = scalar_lea.vmem (!%p2244_p8), [#allocation3], %s1527_s10  ;;  %p2466_p4 = scmp.ne.s32.totalorder (!%p2244_p8), %s2459_s22, 0 }
  0x68   : > { %2139 = dma.done.wait (%p2466_p4), %s211_s14, 512  }
  0x69   : > { %2141 = vsyncadd (%p2466_p4), %s211_s14, 4294966784  ;;  %p2467_p7 = scmp.eq.s32.totalorder %s2225_s0, 0 }
  0x6b   : > { %2143 = dma.done.wait (%p2467_p7), [#allocation7], 18432   ;;  %p2468_p8 = pmov %p2467_p7 }
  0x6c   : > { %v1790_v0 = vld [vmem:[#allocation6 + $0x4] ss:$16 sps:$4 sm:$0xff]   ;;  %v1792_v1 = vld [vmem:[#allocation6 + $0xc] ss:$16 sps:$4 sm:$0xff]   ;;  %v1794_v2 = vld [vmem:[#allocation6] ss:$16 sps:$4 sm:$0xff]  }
  0x6d   : > { %2145 = vsyncadd (%p2468_p8), [#allocation7], 4294948864  ;;  %1042 = vmatprep.subr.bf16.mxu0 %v1790_v0  ;;  %v1795_v3 = vld [vmem:[#allocation6 + $0x8] ss:$16 sps:$4 sm:$0xff]   ;;  %1128 = vmatprep.subr.bf16.mxu1 %v1792_v1  ;;  %v1796_v4 = vld [vmem:[#allocation6 + $0x24] ss:$16 sps:$4 sm:$0xff]  }
  0x6e   : > { %1043 = vmatpush1.bf16.msra.mxu0 %v1794_v2  ;;  %1129 = vmatpush1.bf16.msra.mxu1 %v1795_v3  ;;  %v1798_v5 = vld [vmem:[#allocation6 + $0x2c] ss:$16 sps:$4 sm:$0xff]   ;;  %v1800_v6 = vld [vmem:[#allocation6 + $0x20] ss:$16 sps:$4 sm:$0xff]   ;;  %v1801_v7 = vld [vmem:[#allocation6 + $0x28] ss:$16 sps:$4 sm:$0xff]  }
  0x6f   : > { %1044 = vmatprep.subr.bf16.mxu0 %v1796_v4  ;;  %1130 = vmatprep.subr.bf16.mxu1 %v1798_v5  ;;  %v1802_v8 = vld [vmem:[#allocation6 + $0x44] ss:$16 sps:$4 sm:$0xff]   ;;  %v1804_v9 = vld [vmem:[#allocation6 + $0x4c] ss:$16 sps:$4 sm:$0xff]   ;;  %v1806_v10 = vld [vmem:[#allocation6 + $0x40] ss:$16 sps:$4 sm:$0xff]  }
  0x70   : > { %v1807_v11 = vld [vmem:[#allocation6 + $0x48] ss:$16 sps:$4 sm:$0xff]   ;;  %v1808_v12 = vld [vmem:[#allocation6 + $0x64] ss:$16 sps:$4 sm:$0xff]   ;;  %v1810_v13 = vld [vmem:[#allocation6 + $0x6c] ss:$16 sps:$4 sm:$0xff]  }
  0x71   : > { %v1812_v14 = vld [vmem:[#allocation6 + $0x60] ss:$16 sps:$4 sm:$0xff]   ;;  %v1813_v15 = vld [vmem:[#allocation6 + $0x68] ss:$16 sps:$4 sm:$0xff]   ;;  %v1814_v16 = vld [vmem:[#allocation6 + $0x84] ss:$16 sps:$4 sm:$0xff]  }
  0x72   : > { %1045 = vmatpush1.bf16.msra.mxu0 %v1800_v6  ;;  %1131 = vmatpush1.bf16.msra.mxu1 %v1801_v7  ;;  %v1816_v17 = vld [vmem:[#allocation6 + $0x8c] ss:$16 sps:$4 sm:$0xff]   ;;  %v1818_v18 = vld [vmem:[#allocation6 + $0x80] ss:$16 sps:$4 sm:$0xff]   ;;  %v1819_v19 = vld [vmem:[#allocation6 + $0x88] ss:$16 sps:$4 sm:$0xff]  }
  0x73   : > { %1046 = vmatprep.subr.bf16.mxu0 %v1802_v8  ;;  %1132 = vmatprep.subr.bf16.mxu1 %v1804_v9  ;;  %v1820_v20 = vld [vmem:[#allocation6 + $0xa4] ss:$16 sps:$4 sm:$0xff]   ;;  %v1822_v21 = vld [vmem:[#allocation6 + $0xac] ss:$16 sps:$4 sm:$0xff]   ;;  %v1824_v22 = vld [vmem:[#allocation6 + $0xa0] ss:$16 sps:$4 sm:$0xff]  }
  0x74   : > { %v1825_v23 = vld [vmem:[#allocation6 + $0xa8] ss:$16 sps:$4 sm:$0xff]   ;;  %v1826_v24 = vld [vmem:[#allocation6 + $0xc4] ss:$16 sps:$4 sm:$0xff]   ;;  %v1828_v25 = vld [vmem:[#allocation6 + $0xcc] ss:$16 sps:$4 sm:$0xff]  }
  0x75   : > { %v1830_v26 = vld [vmem:[#allocation6 + $0xc0] ss:$16 sps:$4 sm:$0xff]   ;;  %v1831_v27 = vld [vmem:[#allocation6 + $0xc8] ss:$16 sps:$4 sm:$0xff]   ;;  %v1832_v28 = vld [vmem:[#allocation6 + $0xe4] ss:$16 sps:$4 sm:$0xff]  }
  0x76   : > { %1047 = vmatpush1.bf16.msra.mxu0 %v1806_v10  ;;  %1133 = vmatpush1.bf16.msra.mxu1 %v1807_v11  ;;  %v1834_v29 = vld [vmem:[#allocation6 + $0xec] ss:$16 sps:$4 sm:$0xff]   ;;  %v1836_v30 = vld [vmem:[#allocation6 + $0xe0] ss:$16 sps:$4 sm:$0xff]   ;;  %v1837_v31 = vld [vmem:[#allocation6 + $0xe8] ss:$16 sps:$4 sm:$0xff]  }
  0x77   : > { %1048 = vmatprep.subr.bf16.mxu0 %v1808_v12  ;;  %1134 = vmatprep.subr.bf16.mxu1 %v1810_v13  ;;  %v1838_v32 = vld [vmem:[#allocation6 + $0x104] ss:$16 sps:$4 sm:$0xff]   ;;  %v1840_v33 = vld [vmem:[#allocation6 + $0x10c] ss:$16 sps:$4 sm:$0xff]   ;;  %v1842_v34 = vld [vmem:[#allocation6 + $0x100] ss:$16 sps:$4 sm:$0xff]  }
  0x78   : > { %v1843_v35 = vld [vmem:[#allocation6 + $0x108] ss:$16 sps:$4 sm:$0xff]   ;;  %v1844_v36 = vld [vmem:[#allocation6 + $0x124] ss:$16 sps:$4 sm:$0xff]   ;;  %v1846_v37 = vld [vmem:[#allocation6 + $0x12c] ss:$16 sps:$4 sm:$0xff]  }
  0x79   : > { %v1848_v38 = vld [vmem:[#allocation6 + $0x120] ss:$16 sps:$4 sm:$0xff]   ;;  %v1849_v39 = vld [vmem:[#allocation6 + $0x128] ss:$16 sps:$4 sm:$0xff]   ;;  %v1850_v40 = vld [vmem:[#allocation6 + $0x144] ss:$16 sps:$4 sm:$0xff]  }
  0x7a   : > { %1049 = vmatpush1.bf16.msra.mxu0 %v1812_v14  ;;  %1135 = vmatpush1.bf16.msra.mxu1 %v1813_v15  ;;  %v1852_v41 = vld [vmem:[#allocation6 + $0x14c] ss:$16 sps:$4 sm:$0xff]   ;;  %v1854_v42 = vld [vmem:[#allocation6 + $0x140] ss:$16 sps:$4 sm:$0xff]   ;;  %v1855_v43 = vld [vmem:[#allocation6 + $0x148] ss:$16 sps:$4 sm:$0xff]  }
  0x7b   : > { %1050 = vmatprep.subr.bf16.mxu0 %v1814_v16  ;;  %1136 = vmatprep.subr.bf16.mxu1 %v1816_v17  ;;  %v1856_v44 = vld [vmem:[#allocation6 + $0x164] ss:$16 sps:$4 sm:$0xff]   ;;  %v1858_v45 = vld [vmem:[#allocation6 + $0x16c] ss:$16 sps:$4 sm:$0xff]   ;;  %v1860_v46 = vld [vmem:[#allocation6 + $0x160] ss:$16 sps:$4 sm:$0xff]  }
  0x7c   : > { %v1861_v47 = vld [vmem:[#allocation6 + $0x168] ss:$16 sps:$4 sm:$0xff]   ;;  %v1888_v48 = vld [vmem:[%s2386_s15 + $0x4] ss:$16 sps:$4 sm:$0xff]   ;;  %v1864_v50 = vld [vmem:[#allocation6 + $0x18c] ss:$16 sps:$4 sm:$0xff]  }
  0x7d   : > { %v1862_v49 = vld [vmem:[#allocation6 + $0x184] ss:$16 sps:$4 sm:$0xff]   ;;  %1074 = vmatprep.mubr.bf16.mxu0 %v1888_v48  ;;  %1160 = vmatprep.mubr.bf16.mxu1 %v1888_v48  ;;  %v1866_v51 = vld [vmem:[#allocation6 + $0x180] ss:$16 sps:$4 sm:$0xff]   ;;  %v1867_v52 = vld [vmem:[#allocation6 + $0x188] ss:$16 sps:$4 sm:$0xff]  }
  0x7e   : > { %1051 = vmatpush1.bf16.msra.mxu0 %v1818_v18  ;;  %1137 = vmatpush1.bf16.msra.mxu1 %v1819_v19  ;;  %v1868_v53 = vld [vmem:[#allocation6 + $0x1a4] ss:$16 sps:$4 sm:$0xff]   ;;  %v1870_v54 = vld [vmem:[#allocation6 + $0x1ac] ss:$16 sps:$4 sm:$0xff]   ;;  %v1872_v55 = vld [vmem:[#allocation6 + $0x1a0] ss:$16 sps:$4 sm:$0xff]  }
  0x7f   : > { %1052 = vmatprep.subr.bf16.mxu0 %v1820_v20  ;;  %1138 = vmatprep.subr.bf16.mxu1 %v1822_v21  ;;  %v1873_v56 = vld [vmem:[#allocation6 + $0x1a8] ss:$16 sps:$4 sm:$0xff]   ;;  %v1874_v57 = vld [vmem:[#allocation6 + $0x1c4] ss:$16 sps:$4 sm:$0xff]   ;;  %v1876_v58 = vld [vmem:[#allocation6 + $0x1cc] ss:$16 sps:$4 sm:$0xff]  }
  0x80   : > { %v1878_v59 = vld [vmem:[#allocation6 + $0x1c0] ss:$16 sps:$4 sm:$0xff]   ;;  %v1879_v60 = vld [vmem:[#allocation6 + $0x1c8] ss:$16 sps:$4 sm:$0xff]   ;;  %v1880_v61 = vld [vmem:[#allocation6 + $0x1e4] ss:$16 sps:$4 sm:$0xff]  }
  0x81   : > { %v1882_v62 = vld [vmem:[#allocation6 + $0x1ec] ss:$16 sps:$4 sm:$0xff]   ;;  %v1884_v63 = vld [vmem:[#allocation6 + $0x1e0] ss:$16 sps:$4 sm:$0xff]   ;;  %v1885_v0 = vld [vmem:[#allocation6 + $0x1e8] ss:$16 sps:$4 sm:$0xff]  }
  0x82   : > { %1053 = vmatpush1.bf16.msra.mxu0 %v1824_v22  ;;  %1139 = vmatpush1.bf16.msra.mxu1 %v1825_v23  ;;  %v1891_v1 = vld [vmem:[#allocation6 + $0x204] ss:$16 sps:$4 sm:$0xff]   ;;  %v1894_v2 = vld [vmem:[#allocation6 + $0x20c] ss:$16 sps:$4 sm:$0xff]   ;;  %v1886_v3 = vld [vmem:[%s2386_s15] ss:$16 sps:$4 sm:$0xff]  }
  0x83   : > { %1054 = vmatprep.subr.bf16.mxu0 %v1826_v24  ;;  %1140 = vmatprep.subr.bf16.mxu1 %v1828_v25  ;;  %v1889_v4 = vld [vmem:[#allocation6 + $0x200] ss:$16 sps:$4 sm:$0xff]   ;;  %v1892_v5 = vld [vmem:[#allocation6 + $0x208] ss:$16 sps:$4 sm:$0xff]   ;;  %v1897_v6 = vld [vmem:[#allocation6 + $0x224] ss:$16 sps:$4 sm:$0xff]  }
  0x84   : > { %v1900_v7 = vld [vmem:[#allocation6 + $0x22c] ss:$16 sps:$4 sm:$0xff]   ;;  %v1895_v8 = vld [vmem:[#allocation6 + $0x220] ss:$16 sps:$4 sm:$0xff]   ;;  %v1898_v9 = vld [vmem:[#allocation6 + $0x228] ss:$16 sps:$4 sm:$0xff]  }
  0x85   : > { %v1903_v10 = vld [vmem:[#allocation6 + $0x244] ss:$16 sps:$4 sm:$0xff]   ;;  %v1906_v11 = vld [vmem:[#allocation6 + $0x24c] ss:$16 sps:$4 sm:$0xff]   ;;  %v1901_v12 = vld [vmem:[#allocation6 + $0x240] ss:$16 sps:$4 sm:$0xff]  }
  0x86   : > { %1055 = vmatpush1.bf16.msra.mxu0 %v1830_v26  ;;  %1141 = vmatpush1.bf16.msra.mxu1 %v1831_v27  ;;  %v1904_v13 = vld [vmem:[#allocation6 + $0x248] ss:$16 sps:$4 sm:$0xff]   ;;  %v1909_v14 = vld [vmem:[#allocation6 + $0x264] ss:$16 sps:$4 sm:$0xff]   ;;  %v1912_v15 = vld [vmem:[#allocation6 + $0x26c] ss:$16 sps:$4 sm:$0xff]  }
  0x87   : > { %1056 = vmatprep.subr.bf16.mxu0 %v1832_v28  ;;  %1142 = vmatprep.subr.bf16.mxu1 %v1834_v29  ;;  %v1907_v16 = vld [vmem:[#allocation6 + $0x260] ss:$16 sps:$4 sm:$0xff]   ;;  %v1910_v17 = vld [vmem:[#allocation6 + $0x268] ss:$16 sps:$4 sm:$0xff]   ;;  %v1915_v18 = vld [vmem:[#allocation6 + $0x284] ss:$16 sps:$4 sm:$0xff]  }
  0x88   : > { %v1918_v19 = vld [vmem:[#allocation6 + $0x28c] ss:$16 sps:$4 sm:$0xff]   ;;  %v1913_v20 = vld [vmem:[#allocation6 + $0x280] ss:$16 sps:$4 sm:$0xff]   ;;  %v1916_v21 = vld [vmem:[#allocation6 + $0x288] ss:$16 sps:$4 sm:$0xff]  }
  0x89   : > { %v1921_v22 = vld [vmem:[#allocation6 + $0x2a4] ss:$16 sps:$4 sm:$0xff]   ;;  %v1924_v23 = vld [vmem:[#allocation6 + $0x2ac] ss:$16 sps:$4 sm:$0xff]   ;;  %v1919_v24 = vld [vmem:[#allocation6 + $0x2a0] ss:$16 sps:$4 sm:$0xff]  }
  0x8a   : > { %1057 = vmatpush1.bf16.msra.mxu0 %v1836_v30  ;;  %1143 = vmatpush1.bf16.msra.mxu1 %v1837_v31  ;;  %v1922_v25 = vld [vmem:[#allocation6 + $0x2a8] ss:$16 sps:$4 sm:$0xff]   ;;  %v1927_v26 = vld [vmem:[#allocation6 + $0x2c4] ss:$16 sps:$4 sm:$0xff]   ;;  %v1930_v27 = vld [vmem:[#allocation6 + $0x2cc] ss:$16 sps:$4 sm:$0xff]  }
  0x8b   : > { %1058 = vmatprep.subr.bf16.mxu0 %v1838_v32  ;;  %1144 = vmatprep.subr.bf16.mxu1 %v1840_v33  ;;  %v1925_v28 = vld [vmem:[#allocation6 + $0x2c0] ss:$16 sps:$4 sm:$0xff]   ;;  %v1928_v29 = vld [vmem:[#allocation6 + $0x2c8] ss:$16 sps:$4 sm:$0xff]   ;;  %v1987_v30 = vld [vmem:[%s2386_s15 + $0xc] ss:$16 sps:$4 sm:$0xff]  }
  0x8c   : > { %v1933_v31 = vld [vmem:[#allocation6 + $0x2e4] ss:$16 sps:$4 sm:$0xff]   ;;  %v1936_v32 = vld [vmem:[#allocation6 + $0x2ec] ss:$16 sps:$4 sm:$0xff]   ;;  %v1931_v33 = vld [vmem:[#allocation6 + $0x2e0] ss:$16 sps:$4 sm:$0xff]  }
  0x8d   : > { %v1960_v48 = vld [vmem:[#allocation6 + $0x36c] ss:$16 sps:$4 sm:$0xff]   ;;  %s1226_s22 = sld [smem:[#allocation2]]  ;;  %s1530_s24 = sshll.u32 %s2382_s9, 4 }
  0x8e   : > { %1059 = vmatpush1.bf16.msra.mxu0 %v1842_v34  ;;  %1145 = vmatpush1.bf16.msra.mxu1 %v1843_v35  ;;  %v1934_v34 = vld [vmem:[#allocation6 + $0x2e8] ss:$16 sps:$4 sm:$0xff]   ;;  %v1939_v35 = vld [vmem:[#allocation6 + $0x304] ss:$16 sps:$4 sm:$0xff]   ;;  %s246_s12 = scalar_lea.vmem [#allocation9], %s1530_s24  ;;  %s1686_s5 = sshll.u32 %s2225_s0, 8 }
  0x8f   : > { %1060 = vmatprep.subr.bf16.mxu0 %v1844_v36  ;;  %1146 = vmatprep.subr.bf16.mxu1 %v1846_v37  ;;  %v1942_v36 = vld [vmem:[#allocation6 + $0x30c] ss:$16 sps:$4 sm:$0xff]   ;;  %v1937_v37 = vld [vmem:[#allocation6 + $0x300] ss:$16 sps:$4 sm:$0xff]   ;;  %s1425_s13 = sshll.u32 %s246_s12, 4  ;;  %s2407_s8 = scalar_lea.hbm %s2455_s4, %s1686_s5  ;;  %s2402_s13 = int_to_ptr.vmem [resolvable:$true] %s1425_s13 }
  0x90   : > { %s1412_s25 = scalar_lea.sflag [#allocation5], %s2382_s9  ;;  %s2094_s29 = scalar_lea.vmem %s2402_s13, 256 }
  0x91   : > { %p2095_p11 = scmp.ne.s32.totalorder %s2402_s13, %s2094_s29  ;;  %p2469_p0 = scmp.ne.s32.totalorder %s2464_s21, 0 }
  0x92   : > { %1061 = vmatpush1.bf16.msra.mxu0 %v1848_v38  ;;  %1147 = vmatpush1.bf16.msra.mxu1 %v1849_v39  ;;  %v1940_v38 = vld [vmem:[#allocation6 + $0x308] ss:$16 sps:$4 sm:$0xff]   ;;  %v1945_v39 = vld [vmem:[#allocation6 + $0x324] ss:$16 sps:$4 sm:$0xff]   ;;  %s2173_s0 = smov [#allocation9]  }
  0x93   : > { %1062 = vmatprep.subr.bf16.mxu0 %v1850_v40  ;;  %1148 = vmatprep.subr.bf16.mxu1 %v1852_v41  ;;  %v1948_v40 = vld [vmem:[#allocation6 + $0x32c] ss:$16 sps:$4 sm:$0xff]   ;;  %v1943_v41 = vld [vmem:[#allocation6 + $0x320] ss:$16 sps:$4 sm:$0xff]   ;;  %p2096_p2 = pnand %p2095_p11, %p2469_p0  ;;  %s2098_s27 = sshll.u32 %s2173_s0, 4  ;;  %s2099_s27 = int_to_ptr.vmem [resolvable:$false] %s2098_s27 }
  0x94   : > { %s2100_s28 = scalar_lea.vmem %s2099_s27, 512  ;;  %p2101_p5 = scmp.lt.s32.totalorder %s2402_s13, %s2099_s27 }
  0x95   : > { %p2097_p3 = pneg %p2096_p2  ;;  %p2102_p9 = scmp.lt.s32.totalorder %s2100_s28, %s2094_s29 }
  0x96   : > { %1063 = vmatpush1.bf16.msra.mxu0 %v1854_v42  ;;  %1149 = vmatpush1.bf16.msra.mxu1 %v1855_v43  ;;  %v1946_v42 = vld [vmem:[#allocation6 + $0x328] ss:$16 sps:$4 sm:$0xff]   ;;  %v1951_v43 = vld [vmem:[#allocation6 + $0x344] ss:$16 sps:$4 sm:$0xff]  }
  0x97   : > { %1064 = vmatprep.subr.bf16.mxu0 %v1856_v44  ;;  %1150 = vmatprep.subr.bf16.mxu1 %v1858_v45  ;;  %v1954_v44 = vld [vmem:[#allocation6 + $0x34c] ss:$16 sps:$4 sm:$0xff]   ;;  %v1949_v45 = vld [vmem:[#allocation6 + $0x340] ss:$16 sps:$4 sm:$0xff]   ;;  %p2103_p12 = por %p2102_p9, %p2101_p5 }
  0x99   : > { %p2104_p1 = pnand %p2103_p12, %p2097_p3 }
  0x9a   : > { %1065 = vmatpush1.bf16.msra.mxu0 %v1860_v46  ;;  %1151 = vmatpush1.bf16.msra.mxu1 %v1861_v47  ;;  %v1952_v46 = vld [vmem:[#allocation6 + $0x348] ss:$16 sps:$4 sm:$0xff]   ;;  %v1957_v47 = vld [vmem:[#allocation6 + $0x364] ss:$16 sps:$4 sm:$0xff]  }
  0x9b   : > { %1066 = vmatprep.subr.bf16.mxu0 %v1862_v49  ;;  %1152 = vmatprep.subr.bf16.mxu1 %v1864_v50  ;;  %v1955_v49 = vld [vmem:[#allocation6 + $0x360] ss:$16 sps:$4 sm:$0xff]   ;;  %v1958_v50 = vld [vmem:[#allocation6 + $0x368] ss:$16 sps:$4 sm:$0xff]  }
  0x9e   : > { %1067 = vmatpush1.bf16.msra.mxu0 %v1866_v51  ;;  %1153 = vmatpush1.bf16.msra.mxu1 %v1867_v52  ;;  %v1963_v51 = vld [vmem:[#allocation6 + $0x384] ss:$16 sps:$4 sm:$0xff]   ;;  %v1966_v52 = vld [vmem:[#allocation6 + $0x38c] ss:$16 sps:$4 sm:$0xff]  }
  0x9f   : > { %1068 = vmatprep.subr.bf16.mxu0 %v1868_v53  ;;  %1154 = vmatprep.subr.bf16.mxu1 %v1870_v54  ;;  %v1961_v53 = vld [vmem:[#allocation6 + $0x380] ss:$16 sps:$4 sm:$0xff]   ;;  %v1964_v54 = vld [vmem:[#allocation6 + $0x388] ss:$16 sps:$4 sm:$0xff]  }
  0xa2   : > { %1069 = vmatpush1.bf16.msra.mxu0 %v1872_v55  ;;  %1155 = vmatpush1.bf16.msra.mxu1 %v1873_v56  ;;  %v1969_v55 = vld [vmem:[#allocation6 + $0x3a4] ss:$16 sps:$4 sm:$0xff]   ;;  %v1972_v56 = vld [vmem:[#allocation6 + $0x3ac] ss:$16 sps:$4 sm:$0xff]  }
  0xa3   : > { %1070 = vmatprep.subr.bf16.mxu0 %v1874_v57  ;;  %1156 = vmatprep.subr.bf16.mxu1 %v1876_v58  ;;  %v1967_v57 = vld [vmem:[#allocation6 + $0x3a0] ss:$16 sps:$4 sm:$0xff]   ;;  %v1970_v58 = vld [vmem:[#allocation6 + $0x3a8] ss:$16 sps:$4 sm:$0xff]  }
  0xa6   : > { %1071 = vmatpush1.bf16.msra.mxu0 %v1878_v59  ;;  %1157 = vmatpush1.bf16.msra.mxu1 %v1879_v60  ;;  %v1975_v59 = vld [vmem:[#allocation6 + $0x3c4] ss:$16 sps:$4 sm:$0xff]   ;;  %v1978_v60 = vld [vmem:[#allocation6 + $0x3cc] ss:$16 sps:$4 sm:$0xff]  }
  0xa7   : > { %1072 = vmatprep.subr.bf16.mxu0 %v1880_v61  ;;  %1158 = vmatprep.subr.bf16.mxu1 %v1882_v62  ;;  %v1973_v61 = vld [vmem:[#allocation6 + $0x3c0] ss:$16 sps:$4 sm:$0xff]   ;;  %v1976_v62 = vld [vmem:[#allocation6 + $0x3c8] ss:$16 sps:$4 sm:$0xff]  }
  0xaa   : > { %1073 = vmatpush1.bf16.msra.mxu0 %v1884_v63  ;;  %1159 = vmatpush1.bf16.msra.mxu1 %v1885_v0  ;;  %v1981_v63 = vld [vmem:[#allocation6 + $0x3e4] ss:$16 sps:$4 sm:$0xff]   ;;  %v1984_v0 = vld [vmem:[#allocation6 + $0x3ec] ss:$16 sps:$4 sm:$0xff]  }
  0xab   : > { %1085 = vmatprep.subr.bf16.mxu0 %v1891_v1  ;;  %1171 = vmatprep.subr.bf16.mxu1 %v1894_v2  ;;  %v1979_v1 = vld [vmem:[#allocation6 + $0x3e0] ss:$16 sps:$4 sm:$0xff]   ;;  %v1982_v2 = vld [vmem:[#allocation6 + $0x3e8] ss:$16 sps:$4 sm:$0xff]  }
  0xad   : > { %1075 = vmatmul.mubr.bf16.vlgmr.msra.gmra.mrb[0].mxu0 %v1886_v3  ;;  %1161 = vmatmul.mubr.bf16.vlgmr.msra.gmra.mrb[0].mxu1 %v1886_v3  ;;  %v1988_v3 = vld [vmem:[#allocation8 + $0x40] sm:$0xff]  }
  0xae   : > { %1086 = vmatpush1.bf16.msra.mxu0 %v1889_v4  ;;  %1172 = vmatpush1.bf16.msra.mxu1 %v1892_v5  ;;  %v1985_v4 = vld [vmem:[%s2386_s15 + $0x8] ss:$16 sps:$4 sm:$0xff]   ;;  %v1989_v5 = vld [vmem:[#allocation8] sm:$0xff]  }
  0xaf   : > { %1087 = vmatprep.subr.bf16.mxu0 %v1897_v6  ;;  %1173 = vmatprep.subr.bf16.mxu1 %v1900_v7  ;;  %v1990_v6 = vld [vmem:[#allocation8 + $0x48] sm:$0xff]  }
  0xb0   : > { %1117 = vmatprep.mubr.bf16.mxu0 %v1987_v30  ;;  %1203 = vmatprep.mubr.bf16.mxu1 %v1987_v30  ;;  %v1991_v7 = vld [vmem:[#allocation8 + $0x8] sm:$0xff]  }
  0xb2   : > { %1088 = vmatpush1.bf16.msra.mxu0 %v1895_v8  ;;  %1174 = vmatpush1.bf16.msra.mxu1 %v1898_v9  ;;  %v1992_v8 = vld [vmem:[#allocation8 + $0x50] sm:$0xff]  }
  0xb3   : > { %1089 = vmatprep.subr.bf16.mxu0 %v1903_v10  ;;  %1175 = vmatprep.subr.bf16.mxu1 %v1906_v11  ;;  %v1993_v9 = vld [vmem:[#allocation8 + $0x10] sm:$0xff]   ;;  %v1994_v10 = vld [vmem:[#allocation8 + $0x58] sm:$0xff]  }
  0xb4   : > { %v1995_v11 = vld [vmem:[#allocation8 + $0x18] sm:$0xff]  }
  0xb6   : > { %1090 = vmatpush1.bf16.msra.mxu0 %v1901_v12  ;;  %1176 = vmatpush1.bf16.msra.mxu1 %v1904_v13  ;;  %v1996_v12 = vld [vmem:[#allocation8 + $0x60] sm:$0xff]  }
  0xb7   : > { %1091 = vmatprep.subr.bf16.mxu0 %v1909_v14  ;;  %1177 = vmatprep.subr.bf16.mxu1 %v1912_v15  ;;  %v1997_v13 = vld [vmem:[#allocation8 + $0x20] sm:$0xff]   ;;  %v1998_v14 = vld [vmem:[#allocation8 + $0x68] sm:$0xff]  }
  0xb8   : > { %v1999_v15 = vld [vmem:[#allocation8 + $0x28] sm:$0xff]  }
  0xba   : > { %1092 = vmatpush1.bf16.msra.mxu0 %v1907_v16  ;;  %1178 = vmatpush1.bf16.msra.mxu1 %v1910_v17  ;;  %v2000_v16 = vld [vmem:[#allocation8 + $0x70] sm:$0xff]  }
  0xbb   : > { %1093 = vmatprep.subr.bf16.mxu0 %v1915_v18  ;;  %1179 = vmatprep.subr.bf16.mxu1 %v1918_v19  ;;  %v2001_v17 = vld [vmem:[#allocation8 + $0x30] sm:$0xff]   ;;  %v2002_v18 = vld [vmem:[#allocation8 + $0x78] sm:$0xff]  }
  0xbc   : > { %v2003_v19 = vld [vmem:[#allocation8 + $0x38] sm:$0xff]  }
  0xbe   : > { %1094 = vmatpush1.bf16.msra.mxu0 %v1913_v20  ;;  %1180 = vmatpush1.bf16.msra.mxu1 %v1916_v21 }
  0xbf   : > { %1095 = vmatprep.subr.bf16.mxu0 %v1921_v22  ;;  %1181 = vmatprep.subr.bf16.mxu1 %v1924_v23 }
  0xc2   : > { %1096 = vmatpush1.bf16.msra.mxu0 %v1919_v24  ;;  %1182 = vmatpush1.bf16.msra.mxu1 %v1922_v25 }
  0xc3   : > { %1097 = vmatprep.subr.bf16.mxu0 %v1927_v26  ;;  %1183 = vmatprep.subr.bf16.mxu1 %v1930_v27 }
  0xc6   : > { %1098 = vmatpush1.bf16.msra.mxu0 %v1925_v28  ;;  %1184 = vmatpush1.bf16.msra.mxu1 %v1928_v29 }
  0xc7   : > { %1099 = vmatprep.subr.bf16.mxu0 %v1933_v31  ;;  %1185 = vmatprep.subr.bf16.mxu1 %v1936_v32 }
  0xca   : > { %1100 = vmatpush1.bf16.msra.mxu0 %v1931_v33  ;;  %1186 = vmatpush1.bf16.msra.mxu1 %v1934_v34 }
  0xcb   : > { %1101 = vmatprep.subr.bf16.mxu0 %v1939_v35  ;;  %1187 = vmatprep.subr.bf16.mxu1 %v1942_v36  ;;  %v1227_v35 = vstv %s1226_s22 }
  0xce   : > { %1102 = vmatpush1.bf16.msra.mxu0 %v1937_v37  ;;  %1188 = vmatpush1.bf16.msra.mxu1 %v1940_v38 }
  0xcf   : > { %1103 = vmatprep.subr.bf16.mxu0 %v1945_v39  ;;  %1189 = vmatprep.subr.bf16.mxu1 %v1948_v40 }
  0xd2   : > { %1104 = vmatpush1.bf16.msra.mxu0 %v1943_v41  ;;  %1190 = vmatpush1.bf16.msra.mxu1 %v1946_v42 }
  0xd3   : > { %1105 = vmatprep.subr.bf16.mxu0 %v1951_v43  ;;  %1191 = vmatprep.subr.bf16.mxu1 %v1954_v44 }
  0xd6   : > { %1106 = vmatpush1.bf16.msra.mxu0 %v1949_v45  ;;  %1192 = vmatpush1.bf16.msra.mxu1 %v1952_v46 }
  0xd7   : > { %1107 = vmatprep.subr.bf16.mxu0 %v1957_v47  ;;  %1193 = vmatprep.subr.bf16.mxu1 %v1960_v48 }
  0xda   : > { %1108 = vmatpush1.bf16.msra.mxu0 %v1955_v49  ;;  %1194 = vmatpush1.bf16.msra.mxu1 %v1958_v50 }
  0xdb   : > { %1109 = vmatprep.subr.bf16.mxu0 %v1963_v51  ;;  %1195 = vmatprep.subr.bf16.mxu1 %v1966_v52 }
  0xde   : > { %1110 = vmatpush1.bf16.msra.mxu0 %v1961_v53  ;;  %1196 = vmatpush1.bf16.msra.mxu1 %v1964_v54 }
  0xdf   : > { %1111 = vmatprep.subr.bf16.mxu0 %v1969_v55  ;;  %1197 = vmatprep.subr.bf16.mxu1 %v1972_v56 }
  0xe2   : > { %1112 = vmatpush1.bf16.msra.mxu0 %v1967_v57  ;;  %1198 = vmatpush1.bf16.msra.mxu1 %v1970_v58 }
  0xe3   : > { %1113 = vmatprep.subr.bf16.mxu0 %v1975_v59  ;;  %1199 = vmatprep.subr.bf16.mxu1 %v1978_v60 }
  0xe6   : > { %1114 = vmatpush1.bf16.msra.mxu0 %v1973_v61  ;;  %1200 = vmatpush1.bf16.msra.mxu1 %v1976_v62 }
  0xe7   : > { %1115 = vmatprep.subr.bf16.mxu0 %v1981_v63  ;;  %1201 = vmatprep.subr.bf16.mxu1 %v1984_v0 }
  0xea   : > { %1116 = vmatpush1.bf16.msra.mxu0 %v1979_v1  ;;  %1202 = vmatpush1.bf16.msra.mxu1 %v1982_v2 }
  0xeb   : > { %1687 = vmatprep.subr.bf16.mxu0 %v1988_v3 }
  0xed   : > { %1118 = vmatmul.mubr.bf16.vlgmr.msra.gmra.mrb[0].mxu0 %v1985_v4  ;;  %1204 = vmatmul.mubr.bf16.vlgmr.msra.gmra.mrb[0].mxu1 %v1985_v4 }
  0xee   : > { %1688 = vmatpush3.bf16.msra.mxu0 %v1989_v5 }
  0xef   : > { %1689 = vmatprep.subr.bf16.mxu0 %v1990_v6 }
  0xf2   : > { %1690 = vmatpush3.bf16.msra.mxu0 %v1991_v7 }
  0xf3   : > { %1691 = vmatprep.subr.bf16.mxu0 %v1992_v8 }
  0xf6   : > { %1692 = vmatpush3.bf16.msra.mxu0 %v1993_v9 }
  0xf7   : > { %1693 = vmatprep.subr.bf16.mxu0 %v1994_v10 }
  0xfa   : > { %1694 = vmatpush3.bf16.msra.mxu0 %v1995_v11 }
  0xfb   : > { %1695 = vmatprep.subr.bf16.mxu0 %v1996_v12 }
  0xfe   : > { %1696 = vmatpush3.bf16.msra.mxu0 %v1997_v13 }
  0xff   : > { %1697 = vmatprep.subr.bf16.mxu0 %v1998_v14 }
 0x102   : > { %1698 = vmatpush3.bf16.msra.mxu0 %v1999_v15 }
 0x103   : > { %1699 = vmatprep.subr.bf16.mxu0 %v2000_v16 }
 0x106   : > { %1700 = vmatpush3.bf16.msra.mxu0 %v2001_v17 }
 0x107   : > { %1701 = vmatprep.subr.bf16.mxu0 %v2002_v18 }
 0x10a   : > { %1702 = vmatpush3.bf16.msra.mxu0 %v2003_v19 }
 0x1c0   : > { %v1119_v20 = vpop.f32.mrb[0].mxu0  ;;  %v1205_v21 = vpop.f32.mrb[0].mxu1 }
 0x1c1   : > { %v1214_v22 = vmul.f32 %v1119_v20, %v1119_v20  ;;  %v1218_v23 = vmul.f32 %v1205_v21, %v1205_v21  ;;  %v1121_v24 = vpop.f32.mrb[1].mxu0  ;;  %v1207_v25 = vpop.f32.mrb[1].mxu1 }
 0x1c2   : > { %v1215_v26 = vmul.f32 %v1121_v24, %v1121_v24  ;;  %v1219_v27 = vmul.f32 %v1207_v25, %v1207_v25  ;;  %v1123_v28 = vpop.f32.mrb[2].mxu0  ;;  %v1209_v29 = vpop.f32.mrb[2].mxu1 }
 0x1c3   : > { %v1222_v30 = vadd.f32 %v1218_v23, %v1214_v22  ;;  %v1216_v31 = vmul.f32 %v1123_v28, %v1123_v28  ;;  %v1220_v32 = vmul.f32 %v1209_v29, %v1209_v29  ;;  %v1125_v33 = vpop.f32.mrb[3].mxu0  ;;  %v1211_v34 = vpop.f32.mrb[3].mxu1 }
 0x1c4   : > { %v1223_v36 = vadd.f32 %v1219_v27, %v1215_v26  ;;  %v1217_v37 = vmul.f32 %v1125_v33, %v1125_v33  ;;  %v1221_v38 = vmul.f32 %v1211_v34, %v1211_v34 }
 0x1c5   : > { %v1224_v39 = vadd.f32 %v1220_v32, %v1216_v31  ;;  %v1228_v41 = vmul.f32 %v1227_v35, %v1222_v30 }
 0x1c6   : > { %v1225_v40 = vadd.f32 %v1221_v38, %v1217_v37  ;;  %v1229_v43 = vmul.f32 %v1227_v35, %v1223_v36 }
 0x1c7   : > { %v1230_v42 = vmul.f32 %v1227_v35, %v1224_v39 }
 0x1c8   : > { %v1231_v44 = vmul.f32 %v1227_v35, %v1225_v40 }
 0x1c9   : > { %v1232_v45 = vpack.c.bf16 %v1230_v42, %v1228_v41 }
 0x1ca   : > { %v1233_v46 = vpack.c.bf16 %v1231_v44, %v1229_v43 }
 0x1cc   : > { %1394 = vmatprep.mubr.bf16.mxu0 %v1233_v46 }
 0x1cd   : > { %1395 = vmatmul.mubr.bf16.vlgmr.msra.gmra.mrb[4].mxu0 %v1232_v45 }
 0x2a0   : > { %v1703_v47 = vpop.f32.mrb[4].mxu0 }
 0x2a1   : > { %v1704_v48 = vpop.f32.mrb[5].mxu0 }
 0x2a2   : > { %v1705_v49 = vadd.f32 %v1704_v48, %v1703_v47  ;;  %v1706_v50 = vpop.f32.mrb[6].mxu0 }
 0x2a3   : > { %v1707_v51 = vpop.f32.mrb[7].mxu0 }
 0x2a4   : > { %v1403_v52 = vmax.f32 %v1705_v49, 1e-09  ;;  %v1708_v53 = vadd.f32 %v1707_v51, %v1706_v50 }
 0x2a6   : > { %2004 = vlog2.f32 %v1403_v52  ;;  %v1404_v54 = vmax.f32 %v1708_v53, 1e-09 }
 0x2a8   : > { %2006 = vlog2.f32 %v1404_v54 }
 0x2b0   : > { %v2005_v55 = vpop.eup %2004 }
 0x2b1   : > { %v1406_v56 = vmul.f32 0.6931472, %v2005_v55 }
 0x2b2   : > { %v2007_v57 = vpop.eup %2006 }
 0x2b3   : > { %1409 = vst [vmem:[%s246_s12] sm:$0xff] %v1406_v56  ;;  %v1408_v58 = vmul.f32 0.6931472, %v2007_v57 }
 0x2b5   : > { %1410 = vst [vmem:[%s246_s12 + $0x8] sm:$0xff] %v1408_v58 }
 0x2b6   : > { %2107 = shalt.err (!%p2104_p1)
}
 0x2b7   : > { %s2108_s30 = scalar_lea.hbm %s2407_s8, 256  ;;  %s2112_s14 = scalar_lea.hbm %s2455_s4, 512 }
 0x2b8   : > { %p2109_p13 = scmp.ne.s32.totalorder %s2407_s8, %s2108_s30  ;;  %p2113_p4 = scmp.lt.u32.totalorder %s2407_s8, %s2455_s4 }
 0x2b9   : > { %p2114_p7 = scmp.lt.u32.totalorder %s2112_s14, %s2108_s30  ;;  %p2116_p11 = scmp.lt.u32.totalorder %s2108_s30, %s2407_s8 }
 0x2ba   : > { %p2110_p6 = pnand %p2109_p13, %p2469_p0 }
 0x2bb   : > { %p2115_p8 = por %p2114_p7, %p2113_p4 }
 0x2bc   : > { %p2111_p10 = pneg %p2110_p6 }
 0x2bd   : > { %p2117_p2 = por %p2116_p11, %p2115_p8 }
 0x2bf   : > { %p2118_p3 = pnand %p2117_p2, %p2111_p10 }
 0x2c1   : > { %2121 = shalt.err (!%p2118_p3)
}
 0x2c2   : > { %s2174_s24 = smov 128   ;;  %s2175_s12 = smov 8  }
 0x2c3   : > { %1727 = dma.vmem_to_hbm [thread:$0]  (%p2469_p0), %s2402_s13, 256, %s2407_s8, %s1412_s25, %s2174_s24, %s2174_s24, %s2175_s12  }
 0x2c4 PF: > { %s1440_s5 = sand.u32 1, %s2152_s17   ;;  %p2470_p5 = scmp.ne.s32.totalorder %s2460_s23, 0 }
 0x2c5   : > { %p2471_p9 = scmp.ge.s32.totalorder %s2164_s20, 2  ;;  %s1441_s26 = scalar_lea.sflag [#allocation5], %s1440_s5 }
 0x2c7   : > { %p1741_p12 = pnand %p2471_p9, %p2470_p5 }
 0x2c9   : > { %2147 = dma.done.wait (!%p1741_p12), %s1441_s26, 256  }
 0x2ca   : > { %2149 = vsyncadd (!%p1741_p12), %s1441_s26, 4294967040  ;;  %p19_p1 = scmp.ge.s32.totalorder %s2317_s11, 4   ;;  %s2472_s17 = smov %s2156_s18 }
 0x2cb   : > { %s2473_s18 = smov %s2160_s19  ;;  %s2474_s19 = smov %s2326_s16 }
 0x2cc   : > { %s2475_s20 = smov %s2317_s11  ;;  %21 = sbr.rel (!%p19_p1) target bundleno = 8 (0x8), region = 89 }
 0x2d3   :  { %1446 = vsyncpa [#allocation4], 1 }
 0x2d4   :  { %1448 = vsyncpa [#allocation4 + $0x1], 1 }
 0x2d5   :  { %1449 = vsyncpa [#allocation7], 1 }
 0x2d6   :  { %1450 = vsyncpa [#allocation5], 1 }
 0x2d7   :  { %1452 = vsyncpa [#allocation5 + $0x1], 1 }

</bundles_post_ra>
